<compile_context>
chip_gen: v7x
topology: tpu7x:2x2x1
jax: 0.10.0
libtpu: 0.0.40
codegen_flags: <defaults>
</compile_context>

<pallas_src>
import functools

import jax
import jax.numpy as jnp
from jax.experimental import pallas as pl
from jax.experimental.pallas import tpu as pltpu


# --------------------------------------------------------------------------
# Fused decoder-layer kernel (one grid step == one batch element)
# --------------------------------------------------------------------------

def _layernorm(x, g, b, eps):
    mu = jnp.mean(x, axis=-1, keepdims=True)
    var = jnp.mean(jnp.square(x - mu), axis=-1, keepdims=True)
    return (x - mu) * jax.lax.rsqrt(var + eps) * g + b


def _decoder_layer_kernel(q_ref, k_ref,
                          wq_ref, bq_ref, wkv_ref, bkv_ref,
                          wout_ref, bout_ref,
                          w1_ref, b1_ref, w2_ref, b2_ref,
                          n1w_ref, n1b_ref, n2w_ref, n2b_ref,
                          tgt_ref, *maybe_attn_ref,
                          nhead, matmul_dtype, eps=1e-5):
    def mm(a, b):
        return jnp.dot(a.astype(matmul_dtype), b.astype(matmul_dtype),
                       preferred_element_type=jnp.float32)

    q = q_ref[0].astype(jnp.float32)            # [L, D]  (concat of query, query_pos)
    k = k_ref[0].astype(jnp.float32)            # [S, D]  (concat of src, pos_src)
    L, D = q.shape
    Dh = D // nhead

    # packed in-projections (scale 1/sqrt(Dh) already folded into wq / bq)
    qp = mm(q, wq_ref[...]) + bq_ref[...]       # [L, D]
    kvp = mm(k, wkv_ref[...]) + bkv_ref[...]    # [S, 2D]  (k proj | v proj)

    wout = wout_ref[...]                        # [D, D]  K-major

    # multi-head attention; per-head output folded straight into the out-proj
    attn = bout_ref[...]                        # [1, D] -> broadcasts to [L, D]
    attn_w_sum = None
    for h in range(nhead):                      # static unroll (tiny nhead)
        lo, hi = h * Dh, (h + 1) * Dh
        s = mm(qp[:, lo:hi], kvp[:, lo:hi].T)   # [L, S]
        s = s - jnp.max(s, axis=-1, keepdims=True)
        e = jnp.exp(s)
        p = e * pl.reciprocal(jnp.sum(e, axis=-1, keepdims=True), approx=True)
        oh = mm(p, kvp[:, D + lo:D + hi])       # [L, Dh]
        attn = attn + mm(oh, wout[lo:hi, :])    # accumulate out-projection
        if maybe_attn_ref:
            attn_w_sum = p if attn_w_sum is None else attn_w_sum + p

    # residual + layernorm1
    t = q + attn                                # dropout1 = identity (eval)
    t = _layernorm(t, n1w_ref[...], n1b_ref[...], eps)

    # FFN: linear1 -> relu -> linear2 -> residual -> layernorm2 (all in VMEM)
    hidden = jnp.maximum(mm(t, w1_ref[...]) + b1_ref[...], 0.0)
    t2 = mm(hidden, w2_ref[...]) + b2_ref[...]
    t = _layernorm(t + t2, n2w_ref[...], n2b_ref[...], eps)

    tgt_ref[0] = t.astype(tgt_ref.dtype)        # full [L, D]; E/E_p split done outside
    if maybe_attn_ref:
        maybe_attn_ref[0][0] = (attn_w_sum * (1.0 / nhead)).astype(
            maybe_attn_ref[0].dtype)


# --------------------------------------------------------------------------
# Parameter preparation (hoisted out of the per-forward path)
# --------------------------------------------------------------------------

def prepare_params(raw, nhead):
    """Convert PyTorch-layout params to packed, K-major, pre-scaled kernel params."""
    D = raw["out_w"].shape[0]
    Dh = D // nhead
    scale = 1.0 / (Dh ** 0.5)
    return dict(
        wq=jnp.transpose(raw["in_proj_w"][:D]) * scale,          # [D, D]
        bq=(raw["in_proj_b"][:D] * scale).reshape(1, D),
        wkv=jnp.transpose(raw["in_proj_w"][D:]),                 # [D, 2D]
        bkv=raw["in_proj_b"][D:].reshape(1, 2 * D),
        wout=jnp.transpose(raw["out_w"]),                        # [D, D]
        bout=raw["out_b"].reshape(1, D),
        w1=jnp.transpose(raw["lin1_w"]),                         # [D, F]
        b1=raw["lin1_b"].reshape(1, -1),
        w2=jnp.transpose(raw["lin2_w"]),                         # [F, D]
        b2=raw["lin2_b"].reshape(1, D),
        n1w=raw["norm1_w"].reshape(1, D), n1b=raw["norm1_b"].reshape(1, D),
        n2w=raw["norm2_w"].reshape(1, D), n2b=raw["norm2_b"].reshape(1, D),
    )


# --------------------------------------------------------------------------
# Forward pass (matches TransformerDecoderLayer.forward, eval mode)
# --------------------------------------------------------------------------

@functools.partial(jax.jit,
                   static_argnames=("nhead", "return_attention_map", "matmul_dtype"))
def transformer_decoder_layer(src, pos_src, query, query_pos, params, *, nhead,
                              return_attention_map=True,
                              matmul_dtype=jnp.float32):
    """src: [S,N,E], pos_src: [S,N,E_p], query: [L,N,E], query_pos: [L,N,E_p].
    Returns (tgt [L,N,E], attention_map [N,L,S] or None)."""
    S, N, E = src.shape
    L = query.shape[0]
    Ep = pos_src.shape[2]
    D = params["wq"].shape[0]
    if query.shape[2] != E or E + Ep != D:
        raise ValueError(f"Error in dimension checking - {D}, {E}, {Ep}, {query.shape[2]}")

    # single feature concat + batch-first layout at the kernel boundary
    q_cat = jnp.transpose(jnp.concatenate([query, query_pos], axis=2), (1, 0, 2))  # [N,L,D]
    k_cat = jnp.transpose(jnp.concatenate([src, pos_src], axis=2), (1, 0, 2))      # [N,S,D]

    def batch_spec(blk):
        return pl.BlockSpec(blk, lambda n: (n, 0, 0))

    def resident(arr):
        return pl.BlockSpec(arr.shape, lambda n: (0, 0))      # weights stay resident

    p = params
    weight_args = (p["wq"], p["bq"], p["wkv"], p["bkv"], p["wout"], p["bout"],
                   p["w1"], p["b1"], p["w2"], p["b2"],
                   p["n1w"], p["n1b"], p["n2w"], p["n2b"])

    in_specs = [batch_spec((1, L, D)), batch_spec((1, S, D))] + \
               [resident(w) for w in weight_args]

    if return_attention_map:
        out_shape = (jax.ShapeDtypeStruct((N, L, D), q_cat.dtype),
                     jax.ShapeDtypeStruct((N, L, S), jnp.float32))
        out_specs = (batch_spec((1, L, D)), batch_spec((1, L, S)))
    else:
        out_shape = jax.ShapeDtypeStruct((N, L, D), q_cat.dtype)
        out_specs = batch_spec((1, L, D))

    outs = pl.pallas_call(
        functools.partial(_decoder_layer_kernel, nhead=nhead,
                          matmul_dtype=matmul_dtype),
        out_shape=out_shape,
        grid=(N,),
        in_specs=in_specs,
        out_specs=out_specs,
        compiler_params=pltpu.CompilerParams(dimension_semantics=("parallel",)),
    )(q_cat, k_cat, *weight_args)

    if return_attention_map:
        tgt_full, attn = outs
    else:
        tgt_full, attn = outs, None

    tgt = jnp.transpose(tgt_full[..., :E], (1, 0, 2))   # split([E, E_p]) -> keep tgt only
    return tgt, attn


# --------------------------------------------------------------------------
# Deterministic parameter initialization (PyTorch layouts)
# --------------------------------------------------------------------------

def init_raw_params(key, d_model, dim_ff):
    ks = jax.random.split(key, 8)

    def rnd(k, shape, s=0.05):
        return jax.random.normal(k, shape, jnp.float32) * s

    return dict(
        in_proj_w=rnd(ks[0], (3 * d_model, d_model)),
        in_proj_b=rnd(ks[1], (3 * d_model,)),
        out_w=rnd(ks[2], (d_model, d_model)),
        out_b=rnd(ks[3], (d_model,)),
        lin1_w=rnd(ks[4], (dim_ff, d_model)),
        lin1_b=rnd(ks[5], (dim_ff,)),
        lin2_w=rnd(ks[6], (d_model, dim_ff)),
        lin2_b=rnd(ks[7], (d_model,)),
        norm1_w=jnp.ones((d_model,), jnp.float32),
        norm1_b=jnp.zeros((d_model,), jnp.float32),
        norm2_w=jnp.ones((d_model,), jnp.float32),
        norm2_b=jnp.zeros((d_model,), jnp.float32),
    )


# --------------------------------------------------------------------------
# Demo
# --------------------------------------------------------------------------

if __name__ == "__main__":
    # Config consistent with the module's dimension check:
    #   src_E == query_E and src_E + pos_E == d_model
    d_model, nhead, dim_ff = 32, 4, 64
    E_feat, E_pos = 24, 8
    S, L, N = 16, 8, 2

    key = jax.random.PRNGKey(0)
    k_src, k_pos, k_q, k_qp, k_par = jax.random.split(key, 5)

    src = jax.random.normal(k_src, (S, N, E_feat), jnp.float32)
    pos_src = jax.random.normal(k_pos, (S, N, E_pos), jnp.float32)
    query = jax.random.normal(k_q, (L, N, E_feat), jnp.float32)
    query_pos = jax.random.normal(k_qp, (L, N, E_pos), jnp.float32)

    raw = init_raw_params(k_par, d_model, dim_ff)
    params = prepare_params(raw, nhead)

    # return_attention_map=True path (module default)
    tgt, attn_map = transformer_decoder_layer(
        src, pos_src, query, query_pos, params, nhead=nhead,
        return_attention_map=True)
    tgt = jax.block_until_ready(tgt)
    attn_map = jax.block_until_ready(attn_map)

    assert tgt.shape == (L, N, E_feat)
    assert attn_map.shape == (N, L, S)
    assert bool(jnp.all(jnp.isfinite(tgt)))
    assert bool(jnp.all(jnp.isfinite(attn_map)))
    row_sums = jnp.sum(attn_map, axis=-1)
    assert bool(jnp.all(jnp.abs(row_sums - 1.0) < 1e-2))   # softmax rows ~ 1

    # return_attention_map=False path (no attention-weights HBM stream)
    tgt2, attn2 = transformer_decoder_layer(
        src, pos_src, query, query_pos, params, nhead=nhead,
        return_attention_map=False)
    tgt2 = jax.block_until_ready(tgt2)
    assert attn2 is None
    assert tgt2.shape == (L, N, E_feat)
    assert bool(jnp.allclose(tgt, tgt2, atol=1e-5))

    print("KERNEL_OK")
</pallas_src>

<mosaic_0001>
module attributes {stable_mosaic.version = 11 : i64} {
  func.func @_decoder_layer_kernel(%arg0: i32, %arg1: memref<1x8x32xf32, #tpu.memory_space<vmem>>, %arg2: memref<1x16x32xf32, #tpu.memory_space<vmem>>, %arg3: memref<32x32xf32, #tpu.memory_space<vmem>>, %arg4: memref<1x32xf32, #tpu.memory_space<vmem>>, %arg5: memref<32x64xf32, #tpu.memory_space<vmem>>, %arg6: memref<1x64xf32, #tpu.memory_space<vmem>>, %arg7: memref<32x32xf32, #tpu.memory_space<vmem>>, %arg8: memref<1x32xf32, #tpu.memory_space<vmem>>, %arg9: memref<32x64xf32, #tpu.memory_space<vmem>>, %arg10: memref<1x64xf32, #tpu.memory_space<vmem>>, %arg11: memref<64x32xf32, #tpu.memory_space<vmem>>, %arg12: memref<1x32xf32, #tpu.memory_space<vmem>>, %arg13: memref<1x32xf32, #tpu.memory_space<vmem>>, %arg14: memref<1x32xf32, #tpu.memory_space<vmem>>, %arg15: memref<1x32xf32, #tpu.memory_space<vmem>>, %arg16: memref<1x32xf32, #tpu.memory_space<vmem>>, %arg17: memref<1x8x32xf32, #tpu.memory_space<vmem>>, %arg18: memref<1x8x16xf32, #tpu.memory_space<vmem>>) attributes {dimension_semantics = [#tpu.dimension_semantics<parallel>], iteration_bounds = array<i64: 2>, scalar_prefetch = 0 : i64, scratch_operands = 0 : i64, tpu.core_type = #tpu.core_type<tc>, window_params = [{transform_indices = @transform_0, window_bounds = array<i64: 1, 8, 32>}, {transform_indices = @transform_1, window_bounds = array<i64: 1, 16, 32>}, {pipeline_mode = #tpu.pipeline_mode<synchronous>, transform_indices = @transform_2, window_bounds = array<i64: 32, 32>}, {pipeline_mode = #tpu.pipeline_mode<synchronous>, transform_indices = @transform_3, window_bounds = array<i64: 1, 32>}, {pipeline_mode = #tpu.pipeline_mode<synchronous>, transform_indices = @transform_4, window_bounds = array<i64: 32, 64>}, {pipeline_mode = #tpu.pipeline_mode<synchronous>, transform_indices = @transform_5, window_bounds = array<i64: 1, 64>}, {pipeline_mode = #tpu.pipeline_mode<synchronous>, transform_indices = @transform_6, window_bounds = array<i64: 32, 32>}, {pipeline_mode = #tpu.pipeline_mode<synchronous>, transform_indices = @transform_7, window_bounds = array<i64: 1, 32>}, {pipeline_mode = #tpu.pipeline_mode<synchronous>, transform_indices = @transform_8, window_bounds = array<i64: 32, 64>}, {pipeline_mode = #tpu.pipeline_mode<synchronous>, transform_indices = @transform_9, window_bounds = array<i64: 1, 64>}, {pipeline_mode = #tpu.pipeline_mode<synchronous>, transform_indices = @transform_10, window_bounds = array<i64: 64, 32>}, {pipeline_mode = #tpu.pipeline_mode<synchronous>, transform_indices = @transform_11, window_bounds = array<i64: 1, 32>}, {pipeline_mode = #tpu.pipeline_mode<synchronous>, transform_indices = @transform_12, window_bounds = array<i64: 1, 32>}, {pipeline_mode = #tpu.pipeline_mode<synchronous>, transform_indices = @transform_13, window_bounds = array<i64: 1, 32>}, {pipeline_mode = #tpu.pipeline_mode<synchronous>, transform_indices = @transform_14, window_bounds = array<i64: 1, 32>}, {pipeline_mode = #tpu.pipeline_mode<synchronous>, transform_indices = @transform_15, window_bounds = array<i64: 1, 32>}, {transform_indices = @transform_16, window_bounds = array<i64: 1, 8, 32>}, {transform_indices = @transform_17, window_bounds = array<i64: 1, 8, 16>}]} {
    %c0 = arith.constant 0 : index
    %c0_0 = arith.constant 0 : index
    %c0_1 = arith.constant 0 : index
    %0 = vector.load %arg1[%c0, %c0_0, %c0_1] : memref<1x8x32xf32, #tpu.memory_space<vmem>>, vector<1x8x32xf32>
    %1 = vector.shape_cast %0 : vector<1x8x32xf32> to vector<8x32xf32>
    %c0_2 = arith.constant 0 : index
    %c0_3 = arith.constant 0 : index
    %c0_4 = arith.constant 0 : index
    %2 = vector.load %arg2[%c0_2, %c0_3, %c0_4] : memref<1x16x32xf32, #tpu.memory_space<vmem>>, vector<1x16x32xf32>
    %3 = vector.shape_cast %2 : vector<1x16x32xf32> to vector<16x32xf32>
    %c0_5 = arith.constant 0 : index
    %c0_6 = arith.constant 0 : index
    %4 = vector.load %arg3[%c0_5, %c0_6] : memref<32x32xf32, #tpu.memory_space<vmem>>, vector<32x32xf32>
    %cst = arith.constant dense<0.000000e+00> : vector<8x32xf32>
    %5 = tpu.matmul %1, %4, %cst {dimension_numbers = #tpu.dot_dimension_numbers<[1], [0], [0], [1], [0, 0, 1, 1], [], []>} : vector<8x32xf32>, vector<32x32xf32>, vector<8x32xf32> -> vector<8x32xf32>
    %c0_7 = arith.constant 0 : index
    %c0_8 = arith.constant 0 : index
    %6 = vector.load %arg4[%c0_7, %c0_8] : memref<1x32xf32, #tpu.memory_space<vmem>>, vector<1x32xf32>
    %7 = vector.broadcast %6 : vector<1x32xf32> to vector<8x32xf32>
    %8 = arith.addf %5, %7 : vector<8x32xf32>
    %c0_9 = arith.constant 0 : index
    %c0_10 = arith.constant 0 : index
    %9 = vector.load %arg5[%c0_9, %c0_10] : memref<32x64xf32, #tpu.memory_space<vmem>>, vector<32x64xf32>
    %cst_11 = arith.constant dense<0.000000e+00> : vector<16x64xf32>
    %10 = tpu.matmul %3, %9, %cst_11 {dimension_numbers = #tpu.dot_dimension_numbers<[1], [0], [0], [1], [0, 0, 1, 1], [], []>} : vector<16x32xf32>, vector<32x64xf32>, vector<16x64xf32> -> vector<16x64xf32>
    %c0_12 = arith.constant 0 : index
    %c0_13 = arith.constant 0 : index
    %11 = vector.load %arg6[%c0_12, %c0_13] : memref<1x64xf32, #tpu.memory_space<vmem>>, vector<1x64xf32>
    %12 = vector.broadcast %11 : vector<1x64xf32> to vector<16x64xf32>
    %13 = arith.addf %10, %12 : vector<16x64xf32>
    %c0_14 = arith.constant 0 : index
    %c0_15 = arith.constant 0 : index
    %14 = vector.load %arg7[%c0_14, %c0_15] : memref<32x32xf32, #tpu.memory_space<vmem>>, vector<32x32xf32>
    %c0_16 = arith.constant 0 : index
    %c0_17 = arith.constant 0 : index
    %15 = vector.load %arg8[%c0_16, %c0_17] : memref<1x32xf32, #tpu.memory_space<vmem>>, vector<1x32xf32>
    %16 = vector.extract_strided_slice %8 {offsets = [0, 0], sizes = [8, 8], strides = [1, 1]} : vector<8x32xf32> to vector<8x8xf32>
    %17 = vector.extract_strided_slice %13 {offsets = [0, 0], sizes = [16, 8], strides = [1, 1]} : vector<16x64xf32> to vector<16x8xf32>
    %18 = tpu.transpose %17, [1, 0] : vector<16x8xf32> -> vector<8x16xf32>
    %cst_18 = arith.constant dense<0.000000e+00> : vector<8x16xf32>
    %19 = tpu.matmul %16, %18, %cst_18 {dimension_numbers = #tpu.dot_dimension_numbers<[1], [0], [0], [1], [0, 0, 1, 1], [], []>} : vector<8x8xf32>, vector<8x16xf32>, vector<8x16xf32> -> vector<8x16xf32>
    %cst_19 = arith.constant dense<0xFF800000> : vector<8xf32>
    %20 = vector.multi_reduction <maximumf>, %19, %cst_19 [1] : vector<8x16xf32> to vector<8xf32>
    %21 = vector.shape_cast %20 : vector<8xf32> to vector<8x1xf32>
    %22 = vector.broadcast %21 : vector<8x1xf32> to vector<8x16xf32>
    %23 = arith.subf %19, %22 : vector<8x16xf32>
    %24 = math.exp %23 : vector<8x16xf32>
    %cst_20 = arith.constant dense<0.000000e+00> : vector<8xf32>
    %25 = vector.multi_reduction <add>, %24, %cst_20 [1] : vector<8x16xf32> to vector<8xf32>
    %26 = vector.shape_cast %25 : vector<8xf32> to vector<8x1xf32>
    %27 = tpu.reciprocal %26 {approx = true} : vector<8x1xf32> -> vector<8x1xf32>
    %28 = vector.broadcast %27 : vector<8x1xf32> to vector<8x16xf32>
    %29 = arith.mulf %24, %28 : vector<8x16xf32>
    %30 = vector.extract_strided_slice %13 {offsets = [0, 32], sizes = [16, 8], strides = [1, 1]} : vector<16x64xf32> to vector<16x8xf32>
    %cst_21 = arith.constant dense<0.000000e+00> : vector<8x8xf32>
    %31 = tpu.matmul %29, %30, %cst_21 {dimension_numbers = #tpu.dot_dimension_numbers<[1], [0], [0], [1], [0, 0, 1, 1], [], []>} : vector<8x16xf32>, vector<16x8xf32>, vector<8x8xf32> -> vector<8x8xf32>
    %32 = vector.extract_strided_slice %14 {offsets = [0, 0], sizes = [8, 32], strides = [1, 1]} : vector<32x32xf32> to vector<8x32xf32>
    %cst_22 = arith.constant dense<0.000000e+00> : vector<8x32xf32>
    %33 = tpu.matmul %31, %32, %cst_22 {dimension_numbers = #tpu.dot_dimension_numbers<[1], [0], [0], [1], [0, 0, 1, 1], [], []>} : vector<8x8xf32>, vector<8x32xf32>, vector<8x32xf32> -> vector<8x32xf32>
    %34 = vector.broadcast %15 : vector<1x32xf32> to vector<8x32xf32>
    %35 = arith.addf %34, %33 : vector<8x32xf32>
    %36 = vector.extract_strided_slice %8 {offsets = [0, 8], sizes = [8, 8], strides = [1, 1]} : vector<8x32xf32> to vector<8x8xf32>
    %37 = vector.extract_strided_slice %13 {offsets = [0, 8], sizes = [16, 8], strides = [1, 1]} : vector<16x64xf32> to vector<16x8xf32>
    %38 = tpu.transpose %37, [1, 0] : vector<16x8xf32> -> vector<8x16xf32>
    %cst_23 = arith.constant dense<0.000000e+00> : vector<8x16xf32>
    %39 = tpu.matmul %36, %38, %cst_23 {dimension_numbers = #tpu.dot_dimension_numbers<[1], [0], [0], [1], [0, 0, 1, 1], [], []>} : vector<8x8xf32>, vector<8x16xf32>, vector<8x16xf32> -> vector<8x16xf32>
    %cst_24 = arith.constant dense<0xFF800000> : vector<8xf32>
    %40 = vector.multi_reduction <maximumf>, %39, %cst_24 [1] : vector<8x16xf32> to vector<8xf32>
    %41 = vector.shape_cast %40 : vector<8xf32> to vector<8x1xf32>
    %42 = vector.broadcast %41 : vector<8x1xf32> to vector<8x16xf32>
    %43 = arith.subf %39, %42 : vector<8x16xf32>
    %44 = math.exp %43 : vector<8x16xf32>
    %cst_25 = arith.constant dense<0.000000e+00> : vector<8xf32>
    %45 = vector.multi_reduction <add>, %44, %cst_25 [1] : vector<8x16xf32> to vector<8xf32>
    %46 = vector.shape_cast %45 : vector<8xf32> to vector<8x1xf32>
    %47 = tpu.reciprocal %46 {approx = true} : vector<8x1xf32> -> vector<8x1xf32>
    %48 = vector.broadcast %47 : vector<8x1xf32> to vector<8x16xf32>
    %49 = arith.mulf %44, %48 : vector<8x16xf32>
    %50 = vector.extract_strided_slice %13 {offsets = [0, 40], sizes = [16, 8], strides = [1, 1]} : vector<16x64xf32> to vector<16x8xf32>
    %cst_26 = arith.constant dense<0.000000e+00> : vector<8x8xf32>
    %51 = tpu.matmul %49, %50, %cst_26 {dimension_numbers = #tpu.dot_dimension_numbers<[1], [0], [0], [1], [0, 0, 1, 1], [], []>} : vector<8x16xf32>, vector<16x8xf32>, vector<8x8xf32> -> vector<8x8xf32>
    %52 = vector.extract_strided_slice %14 {offsets = [8, 0], sizes = [8, 32], strides = [1, 1]} : vector<32x32xf32> to vector<8x32xf32>
    %cst_27 = arith.constant dense<0.000000e+00> : vector<8x32xf32>
    %53 = tpu.matmul %51, %52, %cst_27 {dimension_numbers = #tpu.dot_dimension_numbers<[1], [0], [0], [1], [0, 0, 1, 1], [], []>} : vector<8x8xf32>, vector<8x32xf32>, vector<8x32xf32> -> vector<8x32xf32>
    %54 = arith.addf %35, %53 : vector<8x32xf32>
    %55 = arith.addf %29, %49 : vector<8x16xf32>
    %56 = vector.extract_strided_slice %8 {offsets = [0, 16], sizes = [8, 8], strides = [1, 1]} : vector<8x32xf32> to vector<8x8xf32>
    %57 = vector.extract_strided_slice %13 {offsets = [0, 16], sizes = [16, 8], strides = [1, 1]} : vector<16x64xf32> to vector<16x8xf32>
    %58 = tpu.transpose %57, [1, 0] : vector<16x8xf32> -> vector<8x16xf32>
    %cst_28 = arith.constant dense<0.000000e+00> : vector<8x16xf32>
    %59 = tpu.matmul %56, %58, %cst_28 {dimension_numbers = #tpu.dot_dimension_numbers<[1], [0], [0], [1], [0, 0, 1, 1], [], []>} : vector<8x8xf32>, vector<8x16xf32>, vector<8x16xf32> -> vector<8x16xf32>
    %cst_29 = arith.constant dense<0xFF800000> : vector<8xf32>
    %60 = vector.multi_reduction <maximumf>, %59, %cst_29 [1] : vector<8x16xf32> to vector<8xf32>
    %61 = vector.shape_cast %60 : vector<8xf32> to vector<8x1xf32>
    %62 = vector.broadcast %61 : vector<8x1xf32> to vector<8x16xf32>
    %63 = arith.subf %59, %62 : vector<8x16xf32>
    %64 = math.exp %63 : vector<8x16xf32>
    %cst_30 = arith.constant dense<0.000000e+00> : vector<8xf32>
    %65 = vector.multi_reduction <add>, %64, %cst_30 [1] : vector<8x16xf32> to vector<8xf32>
    %66 = vector.shape_cast %65 : vector<8xf32> to vector<8x1xf32>
    %67 = tpu.reciprocal %66 {approx = true} : vector<8x1xf32> -> vector<8x1xf32>
    %68 = vector.broadcast %67 : vector<8x1xf32> to vector<8x16xf32>
    %69 = arith.mulf %64, %68 : vector<8x16xf32>
    %70 = vector.extract_strided_slice %13 {offsets = [0, 48], sizes = [16, 8], strides = [1, 1]} : vector<16x64xf32> to vector<16x8xf32>
    %cst_31 = arith.constant dense<0.000000e+00> : vector<8x8xf32>
    %71 = tpu.matmul %69, %70, %cst_31 {dimension_numbers = #tpu.dot_dimension_numbers<[1], [0], [0], [1], [0, 0, 1, 1], [], []>} : vector<8x16xf32>, vector<16x8xf32>, vector<8x8xf32> -> vector<8x8xf32>
    %72 = vector.extract_strided_slice %14 {offsets = [16, 0], sizes = [8, 32], strides = [1, 1]} : vector<32x32xf32> to vector<8x32xf32>
    %cst_32 = arith.constant dense<0.000000e+00> : vector<8x32xf32>
    %73 = tpu.matmul %71, %72, %cst_32 {dimension_numbers = #tpu.dot_dimension_numbers<[1], [0], [0], [1], [0, 0, 1, 1], [], []>} : vector<8x8xf32>, vector<8x32xf32>, vector<8x32xf32> -> vector<8x32xf32>
    %74 = arith.addf %54, %73 : vector<8x32xf32>
    %75 = arith.addf %55, %69 : vector<8x16xf32>
    %76 = vector.extract_strided_slice %8 {offsets = [0, 24], sizes = [8, 8], strides = [1, 1]} : vector<8x32xf32> to vector<8x8xf32>
    %77 = vector.extract_strided_slice %13 {offsets = [0, 24], sizes = [16, 8], strides = [1, 1]} : vector<16x64xf32> to vector<16x8xf32>
    %78 = tpu.transpose %77, [1, 0] : vector<16x8xf32> -> vector<8x16xf32>
    %cst_33 = arith.constant dense<0.000000e+00> : vector<8x16xf32>
    %79 = tpu.matmul %76, %78, %cst_33 {dimension_numbers = #tpu.dot_dimension_numbers<[1], [0], [0], [1], [0, 0, 1, 1], [], []>} : vector<8x8xf32>, vector<8x16xf32>, vector<8x16xf32> -> vector<8x16xf32>
    %cst_34 = arith.constant dense<0xFF800000> : vector<8xf32>
    %80 = vector.multi_reduction <maximumf>, %79, %cst_34 [1] : vector<8x16xf32> to vector<8xf32>
    %81 = vector.shape_cast %80 : vector<8xf32> to vector<8x1xf32>
    %82 = vector.broadcast %81 : vector<8x1xf32> to vector<8x16xf32>
    %83 = arith.subf %79, %82 : vector<8x16xf32>
    %84 = math.exp %83 : vector<8x16xf32>
    %cst_35 = arith.constant dense<0.000000e+00> : vector<8xf32>
    %85 = vector.multi_reduction <add>, %84, %cst_35 [1] : vector<8x16xf32> to vector<8xf32>
    %86 = vector.shape_cast %85 : vector<8xf32> to vector<8x1xf32>
    %87 = tpu.reciprocal %86 {approx = true} : vector<8x1xf32> -> vector<8x1xf32>
    %88 = vector.broadcast %87 : vector<8x1xf32> to vector<8x16xf32>
    %89 = arith.mulf %84, %88 : vector<8x16xf32>
    %90 = vector.extract_strided_slice %13 {offsets = [0, 56], sizes = [16, 8], strides = [1, 1]} : vector<16x64xf32> to vector<16x8xf32>
    %cst_36 = arith.constant dense<0.000000e+00> : vector<8x8xf32>
    %91 = tpu.matmul %89, %90, %cst_36 {dimension_numbers = #tpu.dot_dimension_numbers<[1], [0], [0], [1], [0, 0, 1, 1], [], []>} : vector<8x16xf32>, vector<16x8xf32>, vector<8x8xf32> -> vector<8x8xf32>
    %92 = vector.extract_strided_slice %14 {offsets = [24, 0], sizes = [8, 32], strides = [1, 1]} : vector<32x32xf32> to vector<8x32xf32>
    %cst_37 = arith.constant dense<0.000000e+00> : vector<8x32xf32>
    %93 = tpu.matmul %91, %92, %cst_37 {dimension_numbers = #tpu.dot_dimension_numbers<[1], [0], [0], [1], [0, 0, 1, 1], [], []>} : vector<8x8xf32>, vector<8x32xf32>, vector<8x32xf32> -> vector<8x32xf32>
    %94 = arith.addf %74, %93 : vector<8x32xf32>
    %95 = arith.addf %75, %89 : vector<8x16xf32>
    %96 = arith.addf %1, %94 : vector<8x32xf32>
    %c0_38 = arith.constant 0 : index
    %c0_39 = arith.constant 0 : index
    %97 = vector.load %arg13[%c0_38, %c0_39] : memref<1x32xf32, #tpu.memory_space<vmem>>, vector<1x32xf32>
    %c0_40 = arith.constant 0 : index
    %c0_41 = arith.constant 0 : index
    %98 = vector.load %arg14[%c0_40, %c0_41] : memref<1x32xf32, #tpu.memory_space<vmem>>, vector<1x32xf32>
    %cst_42 = arith.constant dense<0.000000e+00> : vector<8xf32>
    %99 = vector.multi_reduction <add>, %96, %cst_42 [1] : vector<8x32xf32> to vector<8xf32>
    %100 = vector.shape_cast %99 : vector<8xf32> to vector<8x1xf32>
    %cst_43 = arith.constant 3.200000e+01 : f32
    %101 = vector.broadcast %cst_43 : f32 to vector<8x1xf32>
    %102 = arith.divf %100, %101 : vector<8x1xf32>
    %103 = vector.broadcast %102 : vector<8x1xf32> to vector<8x32xf32>
    %104 = arith.subf %96, %103 : vector<8x32xf32>
    %105 = arith.mulf %104, %104 : vector<8x32xf32>
    %cst_44 = arith.constant dense<0.000000e+00> : vector<8xf32>
    %106 = vector.multi_reduction <add>, %105, %cst_44 [1] : vector<8x32xf32> to vector<8xf32>
    %107 = vector.shape_cast %106 : vector<8xf32> to vector<8x1xf32>
    %cst_45 = arith.constant 3.200000e+01 : f32
    %108 = vector.broadcast %cst_45 : f32 to vector<8x1xf32>
    %109 = arith.divf %107, %108 : vector<8x1xf32>
    %110 = vector.broadcast %102 : vector<8x1xf32> to vector<8x32xf32>
    %111 = arith.subf %96, %110 : vector<8x32xf32>
    %cst_46 = arith.constant 9.99999974E-6 : f32
    %112 = vector.broadcast %cst_46 : f32 to vector<8x1xf32>
    %113 = arith.addf %109, %112 : vector<8x1xf32>
    %114 = math.rsqrt %113 : vector<8x1xf32>
    %115 = vector.broadcast %114 : vector<8x1xf32> to vector<8x32xf32>
    %116 = arith.mulf %111, %115 : vector<8x32xf32>
    %117 = vector.broadcast %97 : vector<1x32xf32> to vector<8x32xf32>
    %118 = arith.mulf %116, %117 : vector<8x32xf32>
    %119 = vector.broadcast %98 : vector<1x32xf32> to vector<8x32xf32>
    %120 = arith.addf %118, %119 : vector<8x32xf32>
    %c0_47 = arith.constant 0 : index
    %c0_48 = arith.constant 0 : index
    %121 = vector.load %arg9[%c0_47, %c0_48] : memref<32x64xf32, #tpu.memory_space<vmem>>, vector<32x64xf32>
    %cst_49 = arith.constant dense<0.000000e+00> : vector<8x64xf32>
    %122 = tpu.matmul %120, %121, %cst_49 {dimension_numbers = #tpu.dot_dimension_numbers<[1], [0], [0], [1], [0, 0, 1, 1], [], []>} : vector<8x32xf32>, vector<32x64xf32>, vector<8x64xf32> -> vector<8x64xf32>
    %c0_50 = arith.constant 0 : index
    %c0_51 = arith.constant 0 : index
    %123 = vector.load %arg10[%c0_50, %c0_51] : memref<1x64xf32, #tpu.memory_space<vmem>>, vector<1x64xf32>
    %124 = vector.broadcast %123 : vector<1x64xf32> to vector<8x64xf32>
    %125 = arith.addf %122, %124 : vector<8x64xf32>
    %cst_52 = arith.constant 0.000000e+00 : f32
    %126 = vector.broadcast %cst_52 : f32 to vector<8x64xf32>
    %127 = arith.maximumf %125, %126 : vector<8x64xf32>
    %c0_53 = arith.constant 0 : index
    %c0_54 = arith.constant 0 : index
    %128 = vector.load %arg11[%c0_53, %c0_54] : memref<64x32xf32, #tpu.memory_space<vmem>>, vector<64x32xf32>
    %cst_55 = arith.constant dense<0.000000e+00> : vector<8x32xf32>
    %129 = tpu.matmul %127, %128, %cst_55 {dimension_numbers = #tpu.dot_dimension_numbers<[1], [0], [0], [1], [0, 0, 1, 1], [], []>} : vector<8x64xf32>, vector<64x32xf32>, vector<8x32xf32> -> vector<8x32xf32>
    %c0_56 = arith.constant 0 : index
    %c0_57 = arith.constant 0 : index
    %130 = vector.load %arg12[%c0_56, %c0_57] : memref<1x32xf32, #tpu.memory_space<vmem>>, vector<1x32xf32>
    %131 = vector.broadcast %130 : vector<1x32xf32> to vector<8x32xf32>
    %132 = arith.addf %129, %131 : vector<8x32xf32>
    %133 = arith.addf %120, %132 : vector<8x32xf32>
    %c0_58 = arith.constant 0 : index
    %c0_59 = arith.constant 0 : index
    %134 = vector.load %arg15[%c0_58, %c0_59] : memref<1x32xf32, #tpu.memory_space<vmem>>, vector<1x32xf32>
    %c0_60 = arith.constant 0 : index
    %c0_61 = arith.constant 0 : index
    %135 = vector.load %arg16[%c0_60, %c0_61] : memref<1x32xf32, #tpu.memory_space<vmem>>, vector<1x32xf32>
    %cst_62 = arith.constant dense<0.000000e+00> : vector<8xf32>
    %136 = vector.multi_reduction <add>, %133, %cst_62 [1] : vector<8x32xf32> to vector<8xf32>
    %137 = vector.shape_cast %136 : vector<8xf32> to vector<8x1xf32>
    %cst_63 = arith.constant 3.200000e+01 : f32
    %138 = vector.broadcast %cst_63 : f32 to vector<8x1xf32>
    %139 = arith.divf %137, %138 : vector<8x1xf32>
    %140 = vector.broadcast %139 : vector<8x1xf32> to vector<8x32xf32>
    %141 = arith.subf %133, %140 : vector<8x32xf32>
    %142 = arith.mulf %141, %141 : vector<8x32xf32>
    %cst_64 = arith.constant dense<0.000000e+00> : vector<8xf32>
    %143 = vector.multi_reduction <add>, %142, %cst_64 [1] : vector<8x32xf32> to vector<8xf32>
    %144 = vector.shape_cast %143 : vector<8xf32> to vector<8x1xf32>
    %cst_65 = arith.constant 3.200000e+01 : f32
    %145 = vector.broadcast %cst_65 : f32 to vector<8x1xf32>
    %146 = arith.divf %144, %145 : vector<8x1xf32>
    %147 = vector.broadcast %139 : vector<8x1xf32> to vector<8x32xf32>
    %148 = arith.subf %133, %147 : vector<8x32xf32>
    %cst_66 = arith.constant 9.99999974E-6 : f32
    %149 = vector.broadcast %cst_66 : f32 to vector<8x1xf32>
    %150 = arith.addf %146, %149 : vector<8x1xf32>
    %151 = math.rsqrt %150 : vector<8x1xf32>
    %152 = vector.broadcast %151 : vector<8x1xf32> to vector<8x32xf32>
    %153 = arith.mulf %148, %152 : vector<8x32xf32>
    %154 = vector.broadcast %134 : vector<1x32xf32> to vector<8x32xf32>
    %155 = arith.mulf %153, %154 : vector<8x32xf32>
    %156 = vector.broadcast %135 : vector<1x32xf32> to vector<8x32xf32>
    %157 = arith.addf %155, %156 : vector<8x32xf32>
    %c0_67 = arith.constant 0 : index
    %c0_68 = arith.constant 0 : index
    %c0_69 = arith.constant 0 : index
    %158 = vector.load %arg17[%c0_67, %c0_68, %c0_69] : memref<1x8x32xf32, #tpu.memory_space<vmem>>, vector<1x8x32xf32>
    %159 = vector.shape_cast %158 : vector<1x8x32xf32> to vector<8x32xf32>
    %160 = vector.shape_cast %157 : vector<8x32xf32> to vector<1x8x32xf32>
    tpu.vector_store %arg17[%c0_67, %c0_68, %c0_69], %160 {strides = array<i32>} : memref<1x8x32xf32, #tpu.memory_space<vmem>>, vector<1x8x32xf32>,
    %cst_70 = arith.constant 2.500000e-01 : f32
    %161 = vector.broadcast %cst_70 : f32 to vector<8x16xf32>
    %162 = arith.mulf %95, %161 : vector<8x16xf32>
    %c0_71 = arith.constant 0 : index
    %c0_72 = arith.constant 0 : index
    %c0_73 = arith.constant 0 : index
    %163 = vector.load %arg18[%c0_71, %c0_72, %c0_73] : memref<1x8x16xf32, #tpu.memory_space<vmem>>, vector<1x8x16xf32>
    %164 = vector.shape_cast %163 : vector<1x8x16xf32> to vector<8x16xf32>
    %165 = vector.shape_cast %162 : vector<8x16xf32> to vector<1x8x16xf32>
    tpu.vector_store %arg18[%c0_71, %c0_72, %c0_73], %165 {strides = array<i32>} : memref<1x8x16xf32, #tpu.memory_space<vmem>>, vector<1x8x16xf32>,
    return
  }
  func.func @transform_0(%arg0: i32) -> (i32, i32, i32) {
    %c0_i32 = arith.constant 0 : i32
    %c0_i32_0 = arith.constant 0 : i32
    %c0_i32_1 = arith.constant 0 : i32
    return %arg0, %c0_i32, %c0_i32_0 : i32, i32, i32
  }
  func.func @transform_1(%arg0: i32) -> (i32, i32, i32) {
    %c0_i32 = arith.constant 0 : i32
    %c0_i32_0 = arith.constant 0 : i32
    %c0_i32_1 = arith.constant 0 : i32
    return %arg0, %c0_i32, %c0_i32_0 : i32, i32, i32
  }
  func.func @transform_2(%arg0: i32) -> (i32, i32) {
    %c0_i32 = arith.constant 0 : i32
    %c0_i32_0 = arith.constant 0 : i32
    %c0_i32_1 = arith.constant 0 : i32
    return %c0_i32, %c0_i32_0 : i32, i32
  }
  func.func @transform_3(%arg0: i32) -> (i32, i32) {
    %c0_i32 = arith.constant 0 : i32
    %c0_i32_0 = arith.constant 0 : i32
    %c0_i32_1 = arith.constant 0 : i32
    return %c0_i32, %c0_i32_0 : i32, i32
  }
  func.func @transform_4(%arg0: i32) -> (i32, i32) {
    %c0_i32 = arith.constant 0 : i32
    %c0_i32_0 = arith.constant 0 : i32
    %c0_i32_1 = arith.constant 0 : i32
    return %c0_i32, %c0_i32_0 : i32, i32
  }
  func.func @transform_5(%arg0: i32) -> (i32, i32) {
    %c0_i32 = arith.constant 0 : i32
    %c0_i32_0 = arith.constant 0 : i32
    %c0_i32_1 = arith.constant 0 : i32
    return %c0_i32, %c0_i32_0 : i32, i32
  }
  func.func @transform_6(%arg0: i32) -> (i32, i32) {
    %c0_i32 = arith.constant 0 : i32
    %c0_i32_0 = arith.constant 0 : i32
    %c0_i32_1 = arith.constant 0 : i32
    return %c0_i32, %c0_i32_0 : i32, i32
  }
  func.func @transform_7(%arg0: i32) -> (i32, i32) {
    %c0_i32 = arith.constant 0 : i32
    %c0_i32_0 = arith.constant 0 : i32
    %c0_i32_1 = arith.constant 0 : i32
    return %c0_i32, %c0_i32_0 : i32, i32
  }
  func.func @transform_8(%arg0: i32) -> (i32, i32) {
    %c0_i32 = arith.constant 0 : i32
    %c0_i32_0 = arith.constant 0 : i32
    %c0_i32_1 = arith.constant 0 : i32
    return %c0_i32, %c0_i32_0 : i32, i32
  }
  func.func @transform_9(%arg0: i32) -> (i32, i32) {
    %c0_i32 = arith.constant 0 : i32
    %c0_i32_0 = arith.constant 0 : i32
    %c0_i32_1 = arith.constant 0 : i32
    return %c0_i32, %c0_i32_0 : i32, i32
  }
  func.func @transform_10(%arg0: i32) -> (i32, i32) {
    %c0_i32 = arith.constant 0 : i32
    %c0_i32_0 = arith.constant 0 : i32
    %c0_i32_1 = arith.constant 0 : i32
    return %c0_i32, %c0_i32_0 : i32, i32
  }
  func.func @transform_11(%arg0: i32) -> (i32, i32) {
    %c0_i32 = arith.constant 0 : i32
    %c0_i32_0 = arith.constant 0 : i32
    %c0_i32_1 = arith.constant 0 : i32
    return %c0_i32, %c0_i32_0 : i32, i32
  }
  func.func @transform_12(%arg0: i32) -> (i32, i32) {
    %c0_i32 = arith.constant 0 : i32
    %c0_i32_0 = arith.constant 0 : i32
    %c0_i32_1 = arith.constant 0 : i32
    return %c0_i32, %c0_i32_0 : i32, i32
  }
  func.func @transform_13(%arg0: i32) -> (i32, i32) {
    %c0_i32 = arith.constant 0 : i32
    %c0_i32_0 = arith.constant 0 : i32
    %c0_i32_1 = arith.constant 0 : i32
    return %c0_i32, %c0_i32_0 : i32, i32
  }
  func.func @transform_14(%arg0: i32) -> (i32, i32) {
    %c0_i32 = arith.constant 0 : i32
    %c0_i32_0 = arith.constant 0 : i32
    %c0_i32_1 = arith.constant 0 : i32
    return %c0_i32, %c0_i32_0 : i32, i32
  }
  func.func @transform_15(%arg0: i32) -> (i32, i32) {
    %c0_i32 = arith.constant 0 : i32
    %c0_i32_0 = arith.constant 0 : i32
    %c0_i32_1 = arith.constant 0 : i32
    return %c0_i32, %c0_i32_0 : i32, i32
  }
  func.func @transform_16(%arg0: i32) -> (i32, i32, i32) {
    %c0_i32 = arith.constant 0 : i32
    %c0_i32_0 = arith.constant 0 : i32
    %c0_i32_1 = arith.constant 0 : i32
    return %arg0, %c0_i32, %c0_i32_0 : i32, i32, i32
  }
  func.func @transform_17(%arg0: i32) -> (i32, i32, i32) {
    %c0_i32 = arith.constant 0 : i32
    %c0_i32_0 = arith.constant 0 : i32
    %c0_i32_1 = arith.constant 0 : i32
    return %arg0, %c0_i32, %c0_i32_0 : i32, i32, i32
  }
}

</mosaic_0001>

<bundles_post_ra>
// kernel: transformer_decoder_layer.1
= control target key start
LH: loop header
LB: loop body
LE: loop exit
PB: predicated region body
PF: predicated region fallthrough
CT: control target
= control target key end

     0   :  { %s3003_s0 = inlined_call_operand.vmem [shape: f32[2,8,32], index: 0, kind: input, shape index: {}]   ;;  %s3004_s1 = inlined_call_operand.vmem [shape: f32[2,16,32], index: 1, kind: input, shape index: {}]   ;;  %s3005_s2 = inlined_call_operand.vmem [shape: f32[32,32], index: 2, kind: input, shape index: {}]   ;;  %s3006_s3 = inlined_call_operand.vmem [shape: f32[1,32], index: 3, kind: input, shape index: {}]   ;;  %s3007_s4 = inlined_call_operand.vmem [shape: f32[32,64], index: 4, kind: input, shape index: {}]   ;;  %s3008_s5 = inlined_call_operand.vmem [shape: f32[1,64], index: 5, kind: input, shape index: {}]   ;;  %s3009_s6 = inlined_call_operand.vmem [shape: f32[32,32], index: 6, kind: input, shape index: {}]   ;;  %s3010_s7 = inlined_call_operand.vmem [shape: f32[1,32], index: 7, kind: input, shape index: {}]   ;;  %s3011_s8 = inlined_call_operand.vmem [shape: f32[32,64], index: 8, kind: input, shape index: {}]   ;;  %s3012_s9 = inlined_call_operand.vmem [shape: f32[1,64], index: 9, kind: input, shape index: {}]   ;;  %s3013_s10 = inlined_call_operand.vmem [shape: f32[64,32], index: 10, kind: input, shape index: {}]   ;;  %s3014_s11 = inlined_call_operand.vmem [shape: f32[1,32], index: 11, kind: input, shape index: {}]   ;;  %s3015_s12 = inlined_call_operand.vmem [shape: f32[1,32], index: 12, kind: input, shape index: {}]   ;;  %s3016_s13 = inlined_call_operand.vmem [shape: f32[1,32], index: 13, kind: input, shape index: {}]   ;;  %s3017_s14 = inlined_call_operand.vmem [shape: f32[1,32], index: 14, kind: input, shape index: {}]   ;;  %s3018_s15 = inlined_call_operand.vmem [shape: f32[1,32], index: 15, kind: input, shape index: {}]   ;;  %s3019_s16 = inlined_call_operand.vmem [shape: f32[2,8,32], index: 16, kind: output, shape index: {0}]   ;;  %s3020_s17 = inlined_call_operand.hbm [shape: f32[2,8,16], index: 17, kind: output, shape index: {1}]  }
   0x1   :  { %3027 = sst [smem:[#allocation8_spill]] %s3003_s0 }
   0x2   :  { %3028 = sst [smem:[#allocation9_spill]] %s3004_s1 }
   0x3   :  { %3029 = sst [smem:[#allocation10_spill]] %s3005_s2 }
   0x4   :  { %3030 = sst [smem:[#allocation11_spill]] %s3006_s3 }
   0x5   :  { %3031 = sst [smem:[#allocation12_spill]] %s3007_s4 }
   0x6   :  { %3032 = sst [smem:[#allocation13_spill]] %s3008_s5 }
   0x7   :  { %3033 = sst [smem:[#allocation14_spill]] %s3009_s6 }
   0x8   :  { %23 = vsyncpa [#allocation3], 0 }
   0x9   :  { %25 = vsyncpa [#allocation3 + $0x1], 0  ;;  %s2668_s24 = smov 0   ;;  %s2670_s25 = smov 0  }
   0xa   :  { %s2672_s26 = smov 0   ;;  %s2674_s27 = smov 0  }
   0xb LB: > { %3034 = sst [smem:[#allocation5_spill]] %s2561_s26  ;;  %s2689_s28 = sadd.s32 4294967295, %s2565_s27   ;;  %s2565_s27 = sphi %s2674_s27, %s3051_s27   ;;  %s2561_s26 = sphi %s2672_s26, %s3053_s26   ;;  %s2557_s25 = sphi %s2670_s25, %s3055_s25   ;;  %s2553_s24 = sphi %s2668_s24, %s3054_s24  }
   0xc   : > { %s2106_s29 = sadd.s32 4294967294, %s2565_s27   ;;  %s2693_s0 = sadd.s32 1, %s2565_s27  }
   0xd   : > { %3035 = sst [smem:[#allocation6_spill]] %s2693_s0  ;;  %s410_s30 = sadd.s32 1, %s2561_s26 }
   0xe   : > { %s407_s18 = ssub.s32 %s2565_s27, %s2693_s0  ;;  %p420_p0 = scmp.ne.s32.totalorder %s2561_s26, %s2557_s25 }
   0xf   : > { %p408_p1 = scmp.eq.s32.totalorder %s407_s18, 0  ;;  %p421_p2 = scmp.eq.s32.totalorder %s2689_s28, 1 }
  0x10   : > { %p426_p3 = scmp.ne.s32.totalorder %s2557_s25, %s2553_s24  ;;  %p427_p4 = scmp.eq.s32.totalorder %s2106_s29, 1 }
  0x11   : > { %s2704_s19 = scalar_select %p408_p1, %s2561_s26, %s410_s30  }
  0x12   : > { %p2706_p5 = por %p421_p2, %p420_p0  ;;  %p2710_p6 = por %p427_p4, %p426_p3 }
  0x13   : > { %3036 = sst [smem:[#allocation7_spill]] %s2704_s19  ;;  %p2109_p7 = scmp.ge.s32.totalorder %s2565_s27, 1 }
  0x14   : > { %p502_p8 = scmp.lt.s32.totalorder %s2565_s27, 3 }
  0x16   : > { %p503_p9 = pnand %p2109_p7, %p502_p8 }
  0x17   : > { %s3039_s4 = sld [smem:[#allocation12_spill]] (!%p503_p9)  ;;  %p562_p10 = scmp.lt.s32.totalorder (!%p503_p9), %s2689_s28, 1  ;;  %v2567_v5 = vmov (!%p503_p9), 0.0|0.0   ;;  %vm2568_vm0 = vmmov (!%p503_p9), 0   ;;  %v2569_v12 = vmov (!%p503_p9), 0.0   ;;  %vm589_vm1 = vcmask (!%p503_p9), 261120  }
  0x18   : > { %506 = sbr.rel (%p503_p9) target bundleno = 3339 (0xd0b), region = 84  ;;  %2339 = vmatprep.subr.bf16.mxu0 (!%p503_p9), %v2567_v5  ;;  %s3040_s2 = sld [smem:[#allocation10_spill]] (!%p503_p9)  ;;  %2219 = vmatprep.mubr.msk.f32.mxu0 (!%p503_p9), %vm2568_vm0, %v2569_v12  ;;  %vm760_vm2 = vcmask (!%p503_p9), 64512   ;;  %vm840_vm4 = vcmask (!%p503_p9), 130048   ;;  %vm1883_vm5 = vcmask (!%p503_p9), 523264  }
  0x19   : > { %s3041_s30 = sld [smem:[#allocation9_spill]] (!%p503_p9)  ;;  %s3043_s5 = sld [smem:[#allocation13_spill]] (!%p503_p9)  ;;  %vm2775_vm3 = vmpackc.low (!%p503_p9), %vm760_vm2, %vm760_vm2 }
  0x1a   : > { %s3046_s3 = sld [smem:[#allocation11_spill]] (!%p503_p9)  ;;  %s3047_s6 = sld [smem:[#allocation14_spill]] (!%p503_p9) }
  0x1b   : > { %s2576_s19 = smov (!%p503_p9), 72   ;;  %s2150_s18 = sshll.u32 (!%p503_p9), %s2689_s28, 7 }
  0x1d   : > { %v663_v0 = vld [vmem:[%s3039_s4] sm:$0xff] (!%p503_p9)  ;;  %v664_v1 = vld [vmem:[%s3039_s4 + $0x8] sm:$0xff] (!%p503_p9)  ;;  %v665_v2 = vld [vmem:[%s3039_s4 + $0x10] sm:$0xff] (!%p503_p9) }
  0x1e   : > { %v2345_v3 = vpack.c.bf16 (!%p503_p9), %v664_v1, %v663_v0  ;;  %v666_v4 = vld [vmem:[%s3039_s4 + $0x18] sm:$0xff] (!%p503_p9)  ;;  %v578_v6 = vld [vmem:[%s3040_s2] sm:$0xff] (!%p503_p9)  ;;  %v579_v7 = vld [vmem:[%s3040_s2 + $0x8] sm:$0xff] (!%p503_p9) }
  0x1f   : > { %v2349_v8 = vpack.c.bf16 %v666_v4, %v665_v2  ;;  %s2737_s29 = scalar_select %p562_p10, %s2689_s28, 1  ;;  %v2340_v9 = vpack.c.bf16 %v579_v7, %v578_v6  ;;  %v580_v10 = vld [vmem:[%s3040_s2 + $0x10] sm:$0xff]  ;;  %v581_v11 = vld [vmem:[%s3040_s2 + $0x18] sm:$0xff]  ;;  %v2117_v17 = vld [vmem:[%s3043_s5] ss:$0 sm:$0xff] }
  0x20   : > { %2346 = vmatprep.subr.bf16.mxu1 %v2345_v3  ;;  %v2343_v13 = vpack.c.bf16 %v581_v11, %v580_v10  ;;  %s3042_s2 = sld [smem:[#allocation8_spill]]  ;;  %v2115_v27 = vld [vmem:[%s3046_s3] ss:$0 sm:$0xff] }
  0x21   : > { %2348 = vmatpush3.bf16.msra.mxu1 %v2345_v3  ;;  %s2153_s0 = sshll.u32 %s2737_s29, 4  ;;  %2341 = vmatpush3.bf16.msra.mxu0 %v2340_v9  ;;  %s3024_s21 = sshll.u32 %s2737_s29, 3  ;;  %v755_v54 = vld [vmem:[%s3047_s6] sm:$0xff] }
  0x22   : > { %2350 = vmatprep.subr.bf16.mxu1 %v2349_v8  ;;  %s570_s26 = scalar_lea.vmem %s3041_s30, %s2153_s0  ;;  %2342 = vmatprep.subr.bf16.mxu0 %v2567_v5  ;;  %s2571_s30 = smov 120  }
  0x23   : > { %v576_v14 = vld [vmem:[%s570_s26] sm:$0xff]  ;;  %v577_v15 = vld [vmem:[%s570_s26 + $0x8] sm:$0xff]  ;;  %s2572_s26 = smov 112   ;;  %s2574_s0 = smov 104  }
  0x24   : > { %2230 = vmatprep.mubr.msk.f32.mxu1 %vm589_vm1, %v576_v14 }
  0x25   : > { %2352 = vmatpush3.bf16.msra.mxu1 %v2349_v8  ;;  %2344 = vmatpush3.bf16.msra.mxu0 %v2343_v13 }
  0x26   : > { %s565_s4 = scalar_lea.vmem %s3042_s2, %s3024_s21  ;;  %2353 = vmatprep.subr.bf16.mxu0 %v2567_v5  ;;  %2247 = vmatprep.subr.mxu1 %v2569_v12  ;;  %s2573_s2 = smov 88  }
  0x27   : > { %v2759_v16 = vld [vmem:[%s565_s4] sm:$0xff]  ;;  %s2570_s4 = smov 96  }
  0x28   : > { %2231 = vmatmul.mubr.msk.f32.vlgmr.msra.gmra.mrb[0].mxu1 %vm589_vm1, %v577_v15  ;;  %2220 = vmatmul.mubr.msk.f32.vlgmr.msra.gmra.mrb[0].mxu0 %vm589_vm1, %v2759_v16 }
  0x29   : > { %2237 = vmatprep.mubr.msk.f32.mxu0 %vm2568_vm0, %v2569_v12  ;;  %2249 = vmatprep.mubr.msk.f32.mxu1 %vm2568_vm0, %v2569_v12 }
  0x2a   : > { %2248 = vmatpush3.msra.mxu1 %v755_v54 }
  0x2b   : > { %2364 = vmatprep.subr.bf16.mxu1 %v2567_v5 }
  0xfb   : > { %v2232_v18 = vpop.f32.mrb[0].mxu1  ;;  %v659_v19 = vpop.f32.mrb[0].mxu0 }
  0xfc   : > { %v752_v20 = vadd.f32 %v2232_v18, %v2117_v17  ;;  %v746_v21 = vpop.f32.mrb[1].mxu1  ;;  %v2221_v22 = vpop.f32.mrb[1].mxu0  ;;  %v2788_v28 = vadd.f32 %v2115_v27, %v659_v19 }
  0xfd   : > { %v747_v23 = vadd.f32 %v2117_v17, %v746_v21 }
  0xff   : > { %v2779_v25 = vpack.i.bf16 %v752_v20, %v747_v23  ;;  %v2354_v26 = vpack.c.bf16 %v752_v20, %v747_v23 }
 0x101   : > { %2449 = vrot.lane.b32.xlu1 %v2779_v25, %s2570_s4  ;;  %2356 = vmatpush3.bf16.xpose.msk.msra.mxu0 %vm2775_vm3, %v2354_v26  ;;  %s2575_s4 = smov 80  }
 0x102   : > { %2357 = vmatprep.subr.bf16.mxu0 %v2567_v5 }
 0x105   : > { %2454 = vrot.lane.b32.xlu1 %v2779_v25, %s2571_s30 }
 0x108   : > { %2238 = vmatmul.mubr.msk.f32.vlgmr.msra.gmra.mrb[2].mxu0 %vm760_vm2, %v2788_v28 }
 0x109   : > { %2459 = vrot.lane.b32.xlu1 %v2779_v25, %s2572_s26  ;;  %2244 = vmatprep.mubr.msk.f32.mxu0 %vm2568_vm0, %v2569_v12 }
 0x10d   : > { %1258 = vrot.lane.b32.xlu1 %v2788_v28, %s2572_s26  ;;  %s3049_s26 = sand.u32 1, %s2557_s25  }
 0x173   : > { %v2450_v29 = vpop.permute.xlu1 %2449 }
 0x174   : > { %v2452_v30 = vunpack.i.h.bf16 %v2450_v29  ;;  %v2451_v31 = vunpack.i.l.bf16 %v2450_v29 }
 0x176   : > { %v2358_v32 = vpack.c.bf16 %v2452_v30, %v2451_v31 }
 0x177   : > { %v2455_v42 = vpop.permute.xlu1 %2454 }
 0x178   : > { %2359 = vmatpush3.bf16.msra.mxu0 %v2358_v32  ;;  %v2457_v43 = vunpack.i.h.bf16 %v2455_v42  ;;  %v2456_v44 = vunpack.i.l.bf16 %v2455_v42 }
 0x179   : > { %2360 = vmatprep.subr.bf16.mxu0 %v2567_v5 }
 0x17a   : > { %v2361_v47 = vpack.c.bf16 %v2457_v43, %v2456_v44 }
 0x17b   : > { %v2460_v48 = vpop.permute.xlu1 %2459 }
 0x17c   : > { %v2462_v49 = vunpack.i.h.bf16 %v2460_v48  ;;  %v2461_v50 = vunpack.i.l.bf16 %v2460_v48 }
 0x17e   : > { %v2368_v51 = vpack.c.bf16 %v2462_v49, %v2461_v50 }
 0x17f   : > { %v1259_v53 = vpop.permute.xlu1 %1258 }
 0x1db   : > { %v836_v33 = vpop.f32.mrb[2].mxu0 }
 0x1dc   : > { %v2239_v34 = vpop.f32.mrb[3].mxu0  ;;  %v841_v35 = vsel %vm840_vm4, %v836_v33, -inf }
 0x1dd   : > { %842 = vmax.xlane.f32.xlu0 %v841_v35 }
 0x26a   : > { %v843_v36 = vpop.xlane.xlu0 %842 }
 0x26b   : > { %v844_v37 = vsub.f32 %v836_v33, %v843_v36 }
 0x26d   : > { %v845_v38 = vmul.f32 1.442695, %v844_v37 }
 0x26f   : > { %2483 = vpow2.f32 %v845_v38 }
 0x279   : > { %v2484_v39 = vpop.eup %2483 }
 0x27a   : > { %v847_v40 = vsel %vm840_vm4, %v2484_v39, 0.0 }
 0x27b   : > { %848 = vadd.xlane.f32.xlu0 %v847_v40  ;;  %v757_v40 = vld [vmem:[%s3047_s6 + $0x10] sm:$0xff] }
 0x291   : > { %1011 = vrot.lane.b32.xlu0 %v2788_v28, %s2571_s30 }
 0x308   : > { %v849_v41 = vpop.xlane.xlu0 %848 }
 0x309   : > { %2485 = vrcp.f32 %v849_v41 }
 0x30c   : > { %v1012_v52 = vpop.permute.xlu0 %1011 }
 0x313   : > { %v2486_v45 = vpop.eup %2485 }
 0x314   : > { %v2801_v46 = vmul.f32 %v2486_v45, %v2484_v39 }
 0x316   : > { %2245 = vmatmul.mubr.msk.f32.vlgmr.msra.gmra.mrb[4].mxu0 %vm840_vm4, %v2801_v46 }
 0x317   : > { %2363 = vmatpush3.bf16.xpose.msk.msra.mxu0 %vm2775_vm3, %v2361_v47  ;;  %2256 = vmatprep.mubr.msk.f32.mxu0 %vm2568_vm0, %v2569_v12  ;;  %v2125_v47 = vld [vmem:[%s3010_s7] ss:$0 sm:$0xff] }
 0x318   : > { %2367 = vmatprep.subr.bf16.mxu0 %v2567_v5 }
 0x31e   : > { %2257 = vmatmul.mubr.msk.f32.vlgmr.msra.gmra.mrb[6].mxu0 %vm760_vm2, %v1012_v52 }
 0x31f   : > { %2370 = vmatpush3.bf16.xpose.msk.msra.mxu0 %vm2775_vm3, %v2368_v51  ;;  %2275 = vmatprep.mubr.msk.f32.mxu0 %vm2568_vm0, %v2569_v12 }
 0x320   : > { %2374 = vmatprep.subr.bf16.mxu0 %v2567_v5 }
 0x326   : > { %2276 = vmatmul.mubr.msk.f32.vlgmr.msra.gmra.mrb[8].mxu0 %vm760_vm2, %v1259_v53 }
 0x327   : > { %2294 = vmatprep.mubr.msk.f32.mxu0 %vm2568_vm0, %v2569_v12 }
 0x3e9   : > { %v927_v55 = vpop.f32.mrb[4].mxu0 }
 0x3ea   : > { %v2246_v56 = vpop.f32.mrb[5].mxu0  ;;  %2250 = vmatmul.mubr.msk.f32.vlgmr.msra.gmra.mrb[2].mxu1 %vm760_vm2, %v927_v55 }
 0x3eb   : > { %2263 = vmatprep.mubr.msk.f32.mxu1 %vm2568_vm0, %v2569_v12 }
 0x3f1   : > { %v1089_v57 = vpop.f32.mrb[6].mxu0 }
 0x3f2   : > { %v2258_v58 = vpop.f32.mrb[7].mxu0  ;;  %v1093_v59 = vsel %vm840_vm4, %v1089_v57, -inf }
 0x3f3   : > { %1094 = vmax.xlane.f32.xlu1 %v1093_v59 }
 0x3f9   : > { %v1336_v60 = vpop.f32.mrb[8].mxu0 }
 0x3fa   : > { %v2277_v61 = vpop.f32.mrb[9].mxu0  ;;  %v1340_v62 = vsel %vm840_vm4, %v1336_v60, -inf }
 0x3fb   : > { %v758_v61 = vld [vmem:[%s3047_s6 + $0x18] sm:$0xff] }
 0x404   : > { %2464 = vrot.lane.b32.xlu1 %v2779_v25, %s2573_s2 }
 0x408   : > { %1505 = vrot.lane.b32.xlu1 %v2788_v28, %s2574_s0  ;;  %v756_v28 = vld [vmem:[%s3047_s6 + $0x8] sm:$0xff] }
 0x42c   : > { %1341 = vmax.xlane.f32.xlu1 %v1340_v62 }
 0x43d   : > { %2474 = vrot.lane.b32.xlu1 %v2779_v25, %s2575_s4 }
 0x480   : > { %v1095_v63 = vpop.xlane.xlu1 %1094 }
 0x481   : > { %v1096_v0 = vsub.f32 %v1089_v57, %v1095_v63 }
 0x483   : > { %v1097_v1 = vmul.f32 1.442695, %v1096_v0 }
 0x484   : > { %v2465_v2 = vpop.permute.xlu1 %2464 }
 0x485   : > { %2487 = vpow2.f32 %v1097_v1  ;;  %v2467_v3 = vunpack.i.h.bf16 %v2465_v2  ;;  %v2466_v4 = vunpack.i.l.bf16 %v2465_v2 }
 0x487   : > { %v2365_v6 = vpack.c.bf16 %v2467_v3, %v2466_v4 }
 0x488   : > { %v1506_v9 = vpop.permute.xlu1 %1505 }
 0x489   : > { %2366 = vmatpush3.bf16.msra.mxu1 %v2365_v6 }
 0x48a   : > { %2266 = vmatprep.subr.mxu1 %v2569_v12 }
 0x48f   : > { %v2488_v7 = vpop.eup %2487 }
 0x490   : > { %v1099_v8 = vsel %vm840_vm4, %v2488_v7, 0.0 }
 0x491   : > { %1100 = vadd.xlane.f32.xlu0 %v1099_v8 }
 0x4a7   : > { %2469 = vrot.lane.b32.xlu0 %v2779_v25, %s2574_s0  ;;  %s3025_s0 = sand.u32 1, %s2557_s25  }
 0x4a8   : > { %s2876_s23 = sshll.u32 %s3025_s0, 3  ;;  %s2953_s0 = scalar_lea.hbm %s3020_s17, %s2150_s18 }
 0x4a9   : > { %s3026_s30 = scalar_lea.vmem [#allocation2], %s2876_s23  ;;  %s3048_s2 = scalar_lea.vmem [#allocation2], %s2876_s23 }
 0x4aa   : > { %s2011_s4 = sshll.u32 %s3048_s2, 4  ;;  %s2012_s4 = int_to_ptr.vmem [resolvable:$true] %s2011_s4 }
 0x4ab   : > { %s2503_s3 = scalar_lea.vmem %s2012_s4, 128 }
 0x4ac   : > { %p2504_p11 = scmp.ne.s32.totalorder %s2012_s4, %s2503_s3 }
 0x4ae   : > { %p2505_p12 = pnand %p2504_p11, %p2706_p5 }
 0x4b0   : > { %p2506_p13 = pneg %p2505_p12 }
 0x4b9   : > { %v1342_v10 = vpop.xlane.xlu1 %1341 }
 0x4ba   : > { %v1343_v11 = vsub.f32 %v1336_v60, %v1342_v10 }
 0x4bc   : > { %v1344_v13 = vmul.f32 1.442695, %v1343_v11 }
 0x4bd   : > { %v1000_v14 = vpop.f32.mrb[2].mxu1  ;;  %v2475_v29 = vpop.permute.xlu1 %2474 }
 0x4be   : > { %2489 = vpow2.f32 %v1344_v13  ;;  %v2251_v15 = vpop.f32.mrb[3].mxu1  ;;  %v2477_v30 = vunpack.i.h.bf16 %v2475_v29  ;;  %v2476_v31 = vunpack.i.l.bf16 %v2475_v29  ;;  %v1010_v48 = vadd.f32 %v2125_v47, %v1000_v14  ;;  %v1872_v29 = vld [vmem:[%s3013_s10 + $0x20] sm:$0xff] }
 0x4c0   : > { %v2372_v33 = vpack.c.bf16 %v2477_v30, %v2476_v31  ;;  %v1873_v30 = vld [vmem:[%s3013_s10 + $0x28] sm:$0xff] }
 0x4c1   : > { %v2394_v31 = vpack.c.bf16 %v1873_v30, %v1872_v29 }
 0x4c8   : > { %v2490_v17 = vpop.eup %2489 }
 0x4c9   : > { %v1346_v18 = vsel %vm840_vm4, %v2490_v17, 0.0 }
 0x4ca   : > { %1347 = vadd.xlane.f32.xlu0 %v1346_v18  ;;  %v1783_v18 = vld [vmem:[%s3011_s8] sm:$0xff] }
 0x51e   : > { %v1101_v19 = vpop.xlane.xlu0 %1100 }
 0x51f   : > { %2491 = vrcp.f32 %v1101_v19 }
 0x522   : > { %v2470_v20 = vpop.permute.xlu0 %2469 }
 0x523   : > { %v2472_v21 = vunpack.i.h.bf16 %v2470_v20  ;;  %v2471_v22 = vunpack.i.l.bf16 %v2470_v20  ;;  %v1786_v20 = vld [vmem:[%s3011_s8 + $0x18] sm:$0xff] }
 0x525   : > { %v2375_v23 = vpack.c.bf16 %v2472_v21, %v2471_v22  ;;  %v1868_v22 = vld [vmem:[%s3013_s10] sm:$0xff] }
 0x527   : > { %2377 = vmatpush3.bf16.xpose.msk.msra.mxu0 %vm2775_vm3, %v2375_v23  ;;  %v1869_v23 = vld [vmem:[%s3013_s10 + $0x8] sm:$0xff] }
 0x528   : > { %2381 = vmatprep.subr.bf16.mxu0 %v2567_v5 }
 0x529   : > { %v2492_v26 = vpop.eup %2491 }
 0x52a   : > { %v1103_v27 = vmul.f32 %v2492_v26, %v2488_v7  ;;  %v1870_v26 = vld [vmem:[%s3013_s10 + $0x10] sm:$0xff] }
 0x52c   : > { %2264 = vmatmul.mubr.msk.f32.vlgmr.msra.gmra.mrb[4].mxu1 %vm840_vm4, %v1103_v27  ;;  %v1257_v58 = vadd.f32 %v1103_v27, %v2801_v46  ;;  %v2388_v27 = vpack.c.bf16 %v1869_v23, %v1868_v22 }
 0x52d   : > { %2267 = vmatpush3.msra.mxu1 %v756_v28  ;;  %2268 = vmatprep.mubr.msk.f32.mxu1 %vm2568_vm0, %v2569_v12  ;;  %v1871_v28 = vld [vmem:[%s3013_s10 + $0x18] sm:$0xff] }
 0x52e   : > { %2295 = vmatmul.mubr.msk.f32.vlgmr.msra.gmra.mrb[10].mxu0 %vm760_vm2, %v1506_v9  ;;  %2371 = vmatprep.subr.bf16.mxu1 %v2567_v5 }
 0x52f   : > { %2317 = vmatprep.mubr.msk.f32.mxu0 %vm2568_vm0, %v2569_v12 }
 0x557   : > { %v1348_v24 = vpop.xlane.xlu0 %1347 }
 0x558   : > { %2493 = vrcp.f32 %v1348_v24  ;;  %v2391_v24 = vpack.c.bf16 %v1871_v28, %v1870_v26 }
 0x562   : > { %v2494_v32 = vpop.eup %2493 }
 0x563   : > { %v1350_v37 = vmul.f32 %v2494_v32, %v2490_v17 }
 0x565   : > { %v1504_v62 = vadd.f32 %v1350_v37, %v1257_v58 }
 0x5ff   : > { %v1179_v34 = vpop.f32.mrb[4].mxu1 }
 0x600   : > { %v2265_v35 = vpop.f32.mrb[5].mxu1  ;;  %2269 = vmatmul.mubr.msk.f32.vlgmr.msra.gmra.mrb[6].mxu1 %vm760_vm2, %v1179_v34 }
 0x601   : > { %2373 = vmatpush3.bf16.msra.mxu1 %v2372_v33  ;;  %v1583_v36 = vpop.f32.mrb[10].mxu0  ;;  %2282 = vmatprep.mubr.msk.f32.mxu1 %vm2568_vm0, %v2569_v12 }
 0x602   : > { %v2296_v38 = vpop.f32.mrb[11].mxu0  ;;  %v1587_v39 = vsel %vm840_vm4, %v1583_v36, -inf  ;;  %2285 = vmatprep.subr.mxu1 %v2569_v12 }
 0x603   : > { %1588 = vmax.xlane.f32.xlu0 %v1587_v39  ;;  %v2142_v38 = vld [vmem:[%s3016_s13] ss:$0 sm:$0xff] }
 0x604   : > { %2283 = vmatmul.mubr.msk.f32.vlgmr.msra.gmra.mrb[8].mxu1 %vm840_vm4, %v1350_v37 }
 0x605   : > { %2287 = vmatprep.mubr.msk.f32.mxu1 %vm2568_vm0, %v2569_v12  ;;  %2286 = vmatpush3.msra.mxu1 %v757_v40 }
 0x606   : > { %2378 = vmatprep.subr.bf16.mxu1 %v2567_v5 }
 0x690   : > { %v1589_v41 = vpop.xlane.xlu0 %1588 }
 0x691   : > { %v1590_v42 = vsub.f32 %v1583_v36, %v1589_v41  ;;  %v2141_v36 = vld [vmem:[%s3015_s12] ss:$0 sm:$0xff]  ;;  %v1875_v41 = vld [vmem:[%s3013_s10 + $0x38] sm:$0xff] }
 0x693   : > { %v1591_v43 = vmul.f32 1.442695, %v1590_v42 }
 0x695   : > { %2495 = vpow2.f32 %v1591_v43  ;;  %v2143_v43 = vld [vmem:[%s3012_s9] ss:$0 sm:$0xff] }
 0x69f   : > { %v2496_v44 = vpop.eup %2495 }
 0x6a0   : > { %v1593_v45 = vsel %vm840_vm4, %v2496_v44, 0.0 }
 0x6a1   : > { %1594 = vadd.xlane.f32.xlu0 %v1593_v45 }
 0x6b7   : > { %2479 = vrot.lane.b32.xlu0 %v2779_v25, %s2576_s19  ;;  %s1995_s19 = scalar_lea.sflag [#allocation3], %s3049_s26 }
 0x6d3   : > { %v1252_v49 = vpop.f32.mrb[6].mxu1 }
 0x6d4   : > { %v1256_v50 = vadd.f32 %v1252_v49, %v1010_v48  ;;  %v2270_v51 = vpop.f32.mrb[7].mxu1  ;;  %v2145_v49 = vld [vmem:[%s3014_s11] ss:$0 sm:$0xff] }
 0x6d7   : > { %v1426_v52 = vpop.f32.mrb[8].mxu1 }
 0x6d8   : > { %v2284_v53 = vpop.f32.mrb[9].mxu1  ;;  %2288 = vmatmul.mubr.msk.f32.vlgmr.msra.gmra.mrb[10].mxu1 %vm760_vm2, %v1426_v52 }
 0x6d9   : > { %2301 = vmatprep.mubr.msk.f32.mxu1 %vm2568_vm0, %v2569_v12 }
 0x72e   : > { %v1595_v54 = vpop.xlane.xlu0 %1594 }
 0x72f   : > { %2497 = vrcp.f32 %v1595_v54 }
 0x732   : > { %v2480_v25 = vpop.permute.xlu0 %2479 }
 0x733   : > { %v2482_v55 = vunpack.i.h.bf16 %v2480_v25  ;;  %v2481_v56 = vunpack.i.l.bf16 %v2480_v25 }
 0x735   : > { %v2379_v57 = vpack.c.bf16 %v2482_v55, %v2481_v56 }
 0x737   : > { %2380 = vmatpush3.bf16.msra.mxu1 %v2379_v57 }
 0x738   : > { %2304 = vmatprep.subr.mxu1 %v2569_v12 }
 0x739   : > { %v2498_v59 = vpop.eup %2497 }
 0x73a   : > { %v1597_v60 = vmul.f32 %v2498_v59, %v2496_v44 }
 0x73c   : > { %2302 = vmatmul.mubr.msk.f32.vlgmr.msra.gmra.mrb[12].mxu1 %vm840_vm4, %v1597_v60  ;;  %v1751_v63 = vadd.f32 %v1597_v60, %v1504_v62 }
 0x73d   : > { %2305 = vmatpush3.msra.mxu1 %v758_v61  ;;  %2306 = vmatprep.mubr.msk.f32.mxu1 %vm2568_vm0, %v2569_v12 }
 0x73e   : > { %2387 = vmatprep.subr.bf16.mxu1 %v2567_v5  ;;  %v1988_v46 = vmul.f32 0.25, %v1751_v63 }
 0x740   : > { %1989 = vst.msk [vmem:[%s3026_s30] sm:$0xff] %vm840_vm4, %v1988_v46  ;;  %s2577_s30 = smov [#allocation2]  }
 0x741   : > { %s2507_s5 = sshll.u32 %s2577_s30, 4  ;;  %s2508_s5 = int_to_ptr.vmem [resolvable:$false] %s2507_s5 }
 0x742   : > { %s2509_s6 = scalar_lea.vmem %s2508_s5, 256  ;;  %p2510_p0 = scmp.lt.s32.totalorder %s2012_s4, %s2508_s5 }
 0x743   : > { %p2511_p1 = scmp.lt.s32.totalorder %s2509_s6, %s2503_s3 }
 0x745   : > { %p2512_p2 = por %p2511_p1, %p2510_p0 }
 0x747   : > { %p2513_p3 = pnand %p2512_p2, %p2506_p13 }
 0x7ab   : > { %v1499_v0 = vpop.f32.mrb[10].mxu1 }
 0x7ac   : > { %v1503_v1 = vadd.f32 %v1499_v0, %v1256_v50  ;;  %v2289_v2 = vpop.f32.mrb[11].mxu1 }
 0x80f   : > { %v1673_v3 = vpop.f32.mrb[12].mxu1 }
 0x810   : > { %v2303_v4 = vpop.f32.mrb[13].mxu1  ;;  %2307 = vmatmul.mubr.msk.f32.vlgmr.msra.gmra.mrb[14].mxu1 %vm760_vm2, %v1673_v3 }
 0x811   : > { %2336 = vmatprep.mubr.msk.f32.mxu1 %vm2568_vm0, %v2569_v12  ;;  %v1784_v12 = vld [vmem:[%s3011_s8 + $0x8] sm:$0xff]  ;;  %2389 = vmatpush3.bf16.msra.mxu1 %v2388_v27 }
 0x812   : > { %v2382_v19 = vpack.c.bf16 %v1784_v12, %v1783_v18  ;;  %2390 = vmatprep.subr.bf16.mxu1 %v2567_v5 }
 0x814   : > { %2383 = vmatpush3.bf16.msra.mxu0 %v2382_v19 }
 0x815   : > { %2384 = vmatprep.subr.bf16.mxu0 %v2567_v5  ;;  %2392 = vmatpush3.bf16.msra.mxu1 %v2391_v24 }
 0x816   : > { %2393 = vmatprep.subr.bf16.mxu1 %v2567_v5 }
 0x819   : > { %2395 = vmatpush3.bf16.msra.mxu1 %v2394_v31 }
 0x81a   : > { %2396 = vmatprep.subr.bf16.mxu1 %v2567_v5  ;;  %v1874_v5 = vld [vmem:[%s3013_s10 + $0x30] sm:$0xff] }
 0x81b   : > { %v2397_v42 = vpack.c.bf16 %v1875_v41, %v1874_v5 }
 0x81d   : > { %2398 = vmatpush3.bf16.msra.mxu1 %v2397_v42 }
 0x8e3   : > { %v1746_v6 = vpop.f32.mrb[14].mxu1 }
 0x8e4   : > { %v1750_v7 = vadd.f32 %v1746_v6, %v1503_v1  ;;  %v2308_v8 = vpop.f32.mrb[15].mxu1 }
 0x8e6   : > { %v1752_v9 = vadd.f32 %v1750_v7, %v2759_v16  ;;  %v1785_v16 = vld [vmem:[%s3011_s8 + $0x10] sm:$0xff] }
 0x8e7   : > { %v2385_v21 = vpack.c.bf16 %v1786_v20, %v1785_v16 }
 0x8e8   : > { %v1755_v10 = vsel %vm589_vm1, %v1752_v9, 0.0 }
 0x8e9   : > { %1756 = vadd.xlane.f32.xlu1 %v1755_v10  ;;  %2386 = vmatpush3.bf16.msra.mxu0 %v2385_v21 }
 0x976   : > { %v1757_v11 = vpop.xlane.xlu1 %1756 }
 0x977   : > { %v1759_v13 = vmul.f32 0.03125, %v1757_v11 }
 0x979   : > { %v1760_v14 = vsub.f32 %v1752_v9, %v1759_v13 }
 0x97b   : > { %v1761_v15 = vmul.f32 %v1760_v14, %v1760_v14 }
 0x97d   : > { %v1762_v17 = vsel %vm589_vm1, %v1761_v15, 0.0 }
 0x97e   : > { %1763 = vadd.xlane.f32.xlu0 %v1762_v17 }
 0xa0b   : > { %v1764_v32 = vpop.xlane.xlu0 %1763 }
 0xa0c   : > { %v1765_v33 = vmul.f32 0.03125, %v1764_v32 }
 0xa0e   : > { %v1766_v34 = vadd.f32 1e-05, %v1765_v33 }
 0xa10   : > { %2499 = vrsqrt.f32 %v1766_v34 }
 0xa1a   : > { %v2500_v35 = vpop.eup %2499 }
 0xa1b   : > { %v1768_v37 = vmul.f32 %v2500_v35, %v1760_v14 }
 0xa1d   : > { %v1775_v39 = vmul.f32 %v2141_v36, %v1768_v37 }
 0xa1f   : > { %v1782_v40 = vadd.f32 %v2142_v38, %v1775_v39 }
 0xa21   : > { %2318 = vmatmul.mubr.msk.f32.vlgmr.msra.gmra.mrb[12].mxu0 %vm589_vm1, %v1782_v40 }
 0xaf4   : > { %v1863_v44 = vpop.f32.mrb[12].mxu0 }
 0xaf5   : > { %v1864_v45 = vadd.f32 %v2143_v43, %v1863_v44  ;;  %v2319_v47 = vpop.f32.mrb[13].mxu0 }
 0xaf7   : > { %v1867_v48 = vmax.f32 %v1864_v45, 0.0 }
 0xaf9   : > { %2337 = vmatmul.mubr.msk.f32.vlgmr.msra.gmra.mrb[16].mxu1 %vm1883_vm5, %v1867_v48 }
 0xbcc   : > { %v1953_v50 = vpop.f32.mrb[16].mxu1 }
 0xbcd   : > { %v1954_v51 = vadd.f32 %v2145_v49, %v1953_v50  ;;  %v2338_v52 = vpop.f32.mrb[17].mxu1 }
 0xbcf   : > { %v1957_v53 = vadd.f32 %v1954_v51, %v1782_v40 }
 0xbd1   : > { %v1960_v54 = vsel %vm589_vm1, %v1957_v53, 0.0 }
 0xbd2   : > { %1961 = vadd.xlane.f32.xlu1 %v1960_v54 }
 0xc5f   : > { %v1962_v25 = vpop.xlane.xlu1 %1961 }
 0xc60   : > { %v1963_v55 = vmul.f32 0.03125, %v1962_v25 }
 0xc62   : > { %v1964_v56 = vsub.f32 %v1957_v53, %v1963_v55 }
 0xc64   : > { %v1965_v57 = vmul.f32 %v1964_v56, %v1964_v56 }
 0xc66   : > { %v1966_v58 = vsel %vm589_vm1, %v1965_v57, 0.0 }
 0xc67   : > { %1967 = vadd.xlane.f32.xlu1 %v1966_v58 }
 0xc68   : > { %2516 = shalt.err (!%p2513_p3)
}
 0xc69   : > { %s2517_s28 = scalar_lea.hbm %s2953_s0, 128  ;;  %s2521_s2 = scalar_lea.hbm %s3020_s17, 256 }
 0xc6a   : > { %p2518_p4 = scmp.ne.s32.totalorder %s2953_s0, %s2517_s28  ;;  %p2522_p9 = scmp.lt.u32.totalorder %s2953_s0, %s3020_s17 }
 0xc6b   : > { %p2523_p10 = scmp.lt.u32.totalorder %s2521_s2, %s2517_s28  ;;  %p2525_p12 = scmp.lt.u32.totalorder %s2517_s28, %s2953_s0 }
 0xc6c   : > { %p2519_p7 = pnand %p2518_p4, %p2706_p5 }
 0xc6d   : > { %p2524_p11 = por %p2523_p10, %p2522_p9 }
 0xc6e   : > { %p2520_p8 = pneg %p2519_p7 }
 0xc6f   : > { %p2526_p13 = por %p2525_p12, %p2524_p11 }
 0xc71   : > { %p2527_p0 = pnand %p2526_p13, %p2520_p8 }
 0xc73   : > { %2530 = shalt.err (!%p2527_p0)
}
 0xc74   : > { %2399 = dma.vmem_to_hbm [thread:$0]  (%p2706_p5), %s2012_s4, 128, %s2953_s0, %s1995_s19   ;;  %v2147_v63 = vld [vmem:[%s3017_s14] ss:$0 sm:$0xff] }
 0xc75   : > { %v2148_v0 = vld [vmem:[%s3018_s15] ss:$0 sm:$0xff]  ;;  %s3050_s30 = sshll.u32 %s2737_s29, 3 }
 0xc76   : > { %s574_s4 = scalar_lea.vmem %s3019_s16, %s3050_s30 }
 0xcf4   : > { %v1968_v59 = vpop.xlane.xlu1 %1967 }
 0xcf5   : > { %v1969_v60 = vmul.f32 0.03125, %v1968_v59 }
 0xcf7   : > { %v1970_v61 = vadd.f32 1e-05, %v1969_v60 }
 0xcf9   : > { %2501 = vrsqrt.f32 %v1970_v61 }
 0xd03   : > { %v2502_v62 = vpop.eup %2501 }
 0xd04   : > { %v1972_v46 = vmul.f32 %v2502_v62, %v1964_v56 }
 0xd06   : > { %v1979_v1 = vmul.f32 %v2147_v63, %v1972_v46 }
 0xd08   : > { %v1986_v2 = vadd.f32 %v2148_v0, %v1979_v1 }
 0xd0a   : > { %1987 = vst.msk [vmem:[%s574_s4] sm:$0xff] %vm589_vm1, %v1986_v2 }
 0xd0b PF: > { %p2405_p5 = scmp.ge.s32.totalorder %s2565_s27, 2  ;;  %s2030_s0 = sand.u32 1, %s2553_s24  }
 0xd0c   : > { %s2031_s19 = scalar_lea.sflag [#allocation3], %s2030_s0 }
 0xd0d   : > { %p2402_p1 = pnand %p2405_p5, %p2710_p6 }
 0xd0f   : > { %2548 = dma.done.wait (!%p2402_p1), %s2031_s19, 128  }
 0xd10   : > { %2550 = vsyncadd (!%p2402_p1), %s2031_s19, 4294967168  ;;  %s3051_s27 = sld [smem:[#allocation6_spill]]  ;;  %s3052_s29 = sld [smem:[#allocation5_spill]] }
 0xd11   : > { %s3053_s26 = sld [smem:[#allocation7_spill]]  ;;  %s3054_s24 = smov %s2557_s25 }
 0xd16   : > { %p28_p2 = scmp.ge.s32.totalorder %s3051_s27, 4   ;;  %s3055_s25 = smov %s3052_s29 }
 0xd18   :  { %30 = sbr.rel (!%p28_p2) target bundleno = 11 (0xb), region = 134 }
 0xd1f   :  { %2036 = vsyncpa [#allocation3], 1 }
 0xd20   :  { %2038 = vsyncpa [#allocation3 + $0x1], 1 }

</bundles_post_ra>
